<compile_context>
chip_gen: v7x
topology: tpu7x:2x2x1
jax: 0.10.0
libtpu: 0.0.40
codegen_flags: <defaults>
</compile_context>

<pallas_src>
import functools

import jax
import jax.numpy as jnp
from jax.experimental import pallas as pl
from jax.experimental.pallas import tpu as pltpu


def _arz_kernel(xcol_ref, xrow_ref, mask_ref, w1_ref, b1_ref, wm_ref, bm_ref,
                w3_ref, b3_ref, out_ref, *, depth, dt_over_dx):
    # First conv (im2col'ed): [H, K*C_in] @ [K*C_in, B*N] + bias, ReLU.
    h = jnp.dot(w1_ref[...], xcol_ref[...],
                preferred_element_type=jnp.float32) + b1_ref[...]
    h = jnp.maximum(h, 0.0)

    # (depth - 1) hidden 1x1 convs: [H, H] @ [H, B*N] + bias, ReLU.
    for i in range(depth - 1):
        h = jnp.maximum(
            jnp.dot(wm_ref[i], h, preferred_element_type=jnp.float32) + bm_ref[i],
            0.0)

    # Final 1x1 conv to out_channels = 1 -> lane-dense flow [1, B*N].
    flow = jnp.dot(w3_ref[...], h, preferred_element_type=jnp.float32) + b3_ref[...]
    flow = jnp.clip(flow, 0.0, 2.0)                      # torch.clamp(min=0, max=2)

    # flowR = cat(flow[0], flow) along each batch's spatial axis
    #  => diff[n] = flow[n] - flow[n-1] for n >= 1 within a batch, 0 at n == 0.
    # Lane roll + precomputed batch-boundary mask (0 at each batch's first cell).
    shifted = pltpu.roll(flow, shift=1, axis=1)
    diff = (flow - shifted) * mask_ref[...]

    out_ref[...] = xrow_ref[...] - dt_over_dx * diff


def init_params(key, stencil, hidden=10, depth=2, in_channels=2, out_channels=1):
    a, b = stencil
    ksz = a + b + 1
    k1, k2, k3, k4, k5, k6 = jax.random.split(key, 6)
    # Stored as: first conv [K, in, hidden], 1x1 convs [in, out] style (see reference).
    w1 = jax.random.normal(k1, (ksz, in_channels, hidden), jnp.float32) * 0.3
    b1 = jax.random.normal(k2, (1, hidden), jnp.float32) * 0.1
    wm = jax.random.normal(k3, (depth - 1, hidden, hidden), jnp.float32) * 0.3
    bm = jax.random.normal(k4, (depth - 1, 1, hidden), jnp.float32) * 0.1
    w3 = jax.random.normal(k5, (hidden, out_channels), jnp.float32) * 0.3
    b3 = jax.random.normal(k6, (1, out_channels), jnp.float32) * 0.1
    return w1, b1, wm, bm, w3, b3


def arz_forward(x, v, params, stencil, dx=1.0, dt=1.0):
    """Pallas implementation of arzModel.forward (return_flow=False)."""
    a, b = stencil
    w1, b1, wm, bm, w3, b3 = params
    ksz, cin, hidden = w1.shape
    bsz, _, n, _ = x.shape
    bn = bsz * n
    feat = ksz * cin
    depth = wm.shape[0] + 1

    # --- glue (plain JAX): channel concat + replicate-pad + im2col, channel-first ---
    a_cat = jnp.concatenate([x, v], axis=-1)[:, 0, :, :]            # [B, N, 2]
    left = jnp.repeat(a_cat[:, :1, :], a, axis=1)
    right = jnp.repeat(a_cat[:, -1:, :], b, axis=1)
    xpad = jnp.concatenate([left, a_cat, right], axis=1)            # [B, N+a+b, 2]
    windows = jnp.stack([xpad[:, k:k + n, :] for k in range(ksz)], axis=2)  # [B,N,K,2]
    xcol = windows.reshape(bn, feat).T                              # [K*2, B*N]
    xrow = x[:, 0, :, 0].reshape(1, bn)                             # [1, B*N]
    # Mask is 0 at each batch's first cell (flux difference is 0 there).
    mask = (jnp.arange(bn) % n != 0).astype(jnp.float32).reshape(1, bn)

    # Transposed weights so all layers are [out, in] @ [in, B*N] matmuls.
    w1_t = jnp.transpose(w1, (2, 0, 1)).reshape(hidden, feat)       # [H, K*C_in]
    b1_t = b1.T                                                     # [H, 1]
    wm_t = jnp.transpose(wm, (0, 2, 1))                             # [depth-1, H, H]
    bm_t = jnp.transpose(bm, (0, 2, 1))                             # [depth-1, H, 1]
    w3_t = w3.T                                                     # [1, H]

    kernel = functools.partial(_arz_kernel, depth=depth,
                               dt_over_dx=float(dt) / float(dx))

    out = pl.pallas_call(
        kernel,
        out_shape=jax.ShapeDtypeStruct((1, bn), jnp.float32),
        grid_spec=pltpu.PrefetchScalarGridSpec(
            num_scalar_prefetch=0,
            grid=(1,),
            in_specs=[
                pl.BlockSpec((feat, bn), lambda i: (0, 0)),
                pl.BlockSpec((1, bn), lambda i: (0, 0)),
                pl.BlockSpec((1, bn), lambda i: (0, 0)),
                pl.BlockSpec((hidden, feat), lambda i: (0, 0)),
                pl.BlockSpec((hidden, 1), lambda i: (0, 0)),
                pl.BlockSpec(wm_t.shape, lambda i: (0, 0, 0)),
                pl.BlockSpec(bm_t.shape, lambda i: (0, 0, 0)),
                pl.BlockSpec((1, hidden), lambda i: (0, 0)),
                pl.BlockSpec((1, 1), lambda i: (0, 0)),
            ],
            out_specs=pl.BlockSpec((1, bn), lambda i: (0, 0)),
        ),
        compiler_params=pltpu.CompilerParams(dimension_semantics=("arbitrary",)),
    )(xcol, xrow, mask, w1_t, b1_t, wm_t, bm_t, w3_t, b3)

    return out.reshape(bsz, 1, n, 1)                                # [B, 1, N, 1]


def arz_reference(x, v, params, stencil, dx=1.0, dt=1.0):
    """Pure-JAX reference mirroring the PyTorch forward."""
    a, b = stencil
    w1, b1, wm, bm, w3, b3 = params
    ksz = w1.shape[0]
    n = x.shape[2]
    a_cat = jnp.concatenate([x, v], axis=-1)[:, 0, :, :]
    left = jnp.repeat(a_cat[:, :1, :], a, axis=1)
    right = jnp.repeat(a_cat[:, -1:, :], b, axis=1)
    xp = jnp.concatenate([left, a_cat, right], axis=1)
    acc = jnp.zeros((x.shape[0], n, w1.shape[-1]), jnp.float32) + b1
    for k in range(ksz):
        acc = acc + jnp.einsum('bnc,ch->bnh', xp[:, k:k + n, :], w1[k])
    h = jnp.maximum(acc, 0.0)
    for i in range(wm.shape[0]):
        h = jnp.maximum(jnp.einsum('bnh,hg->bng', h, wm[i]) + bm[i], 0.0)
    flow = jnp.clip(jnp.einsum('bnh,ho->bno', h, w3) + b3, 0.0, 2.0)
    flowR = jnp.concatenate([flow[:, :1], flow], axis=1)
    out = x[:, 0] - (dt / dx) * (flowR[:, 1:] - flowR[:, :-1])
    return out[:, None]


if __name__ == "__main__":
    key = jax.random.PRNGKey(0)
    kx, kv, kp = jax.random.split(key, 3)

    B, N = 2, 16
    stencil = (2, 2)          # (a, b) asymmetric stencil -> conv kernel size 5
    hidden, depth = 32, 2
    dx, dt = 1.0, 0.5

    x = jax.random.uniform(kx, (B, 1, N, 1), dtype=jnp.float32)
    v = jax.random.uniform(kv, (B, 1, N, 1), dtype=jnp.float32)
    params = init_params(kp, stencil, hidden=hidden, depth=depth)

    out = arz_forward(x, v, params, stencil, dx=dx, dt=dt)
    out = jax.block_until_ready(out)

    ref = arz_reference(x, v, params, stencil, dx=dx, dt=dt)
    assert out.shape == (B, 1, N, 1)
    assert jnp.allclose(out, ref, atol=1e-4, rtol=1e-4)

    print("KERNEL_OK")
</pallas_src>

<mosaic_0001>
module attributes {stable_mosaic.version = 11 : i64} {
  func.func @_arz_kernel(%arg0: i32, %arg1: memref<10x32xf32, #tpu.memory_space<vmem>>, %arg2: memref<1x32xf32, #tpu.memory_space<vmem>>, %arg3: memref<1x32xf32, #tpu.memory_space<vmem>>, %arg4: memref<32x10xf32, #tpu.memory_space<vmem>>, %arg5: memref<32x1xf32, #tpu.memory_space<vmem>>, %arg6: memref<1x32x32xf32, #tpu.memory_space<vmem>>, %arg7: memref<1x32x1xf32, #tpu.memory_space<vmem>>, %arg8: memref<1x32xf32, #tpu.memory_space<vmem>>, %arg9: memref<1x1xf32, #tpu.memory_space<vmem>>, %arg10: memref<1x32xf32, #tpu.memory_space<vmem>>) attributes {dimension_semantics = [#tpu.dimension_semantics<arbitrary>], iteration_bounds = array<i64: 1>, scalar_prefetch = 0 : i64, scratch_operands = 0 : i64, tpu.core_type = #tpu.core_type<tc>, window_params = [{pipeline_mode = #tpu.pipeline_mode<synchronous>, transform_indices = @transform_0, window_bounds = array<i64: 10, 32>}, {pipeline_mode = #tpu.pipeline_mode<synchronous>, transform_indices = @transform_1, window_bounds = array<i64: 1, 32>}, {pipeline_mode = #tpu.pipeline_mode<synchronous>, transform_indices = @transform_2, window_bounds = array<i64: 1, 32>}, {pipeline_mode = #tpu.pipeline_mode<synchronous>, transform_indices = @transform_3, window_bounds = array<i64: 32, 10>}, {pipeline_mode = #tpu.pipeline_mode<synchronous>, transform_indices = @transform_4, window_bounds = array<i64: 32, 1>}, {pipeline_mode = #tpu.pipeline_mode<synchronous>, transform_indices = @transform_5, window_bounds = array<i64: 1, 32, 32>}, {pipeline_mode = #tpu.pipeline_mode<synchronous>, transform_indices = @transform_6, window_bounds = array<i64: 1, 32, 1>}, {pipeline_mode = #tpu.pipeline_mode<synchronous>, transform_indices = @transform_7, window_bounds = array<i64: 1, 32>}, {pipeline_mode = #tpu.pipeline_mode<synchronous>, transform_indices = @transform_8, window_bounds = array<i64: 1, 1>}, {pipeline_mode = #tpu.pipeline_mode<synchronous>, transform_indices = @transform_9, window_bounds = array<i64: 1, 32>}]} {
    %c0 = arith.constant 0 : index
    %c0_0 = arith.constant 0 : index
    %0 = vector.load %arg4[%c0, %c0_0] : memref<32x10xf32, #tpu.memory_space<vmem>>, vector<32x10xf32>
    %c0_1 = arith.constant 0 : index
    %c0_2 = arith.constant 0 : index
    %1 = vector.load %arg1[%c0_1, %c0_2] : memref<10x32xf32, #tpu.memory_space<vmem>>, vector<10x32xf32>
    %cst = arith.constant dense<0.000000e+00> : vector<32x32xf32>
    %2 = tpu.matmul %0, %1, %cst {dimension_numbers = #tpu.dot_dimension_numbers<[1], [0], [0], [1], [0, 0, 1, 1], [], []>} : vector<32x10xf32>, vector<10x32xf32>, vector<32x32xf32> -> vector<32x32xf32>
    %c0_3 = arith.constant 0 : index
    %c0_4 = arith.constant 0 : index
    %3 = vector.load %arg5[%c0_3, %c0_4] : memref<32x1xf32, #tpu.memory_space<vmem>>, vector<32x1xf32>
    %4 = vector.broadcast %3 : vector<32x1xf32> to vector<32x32xf32>
    %5 = arith.addf %2, %4 : vector<32x32xf32>
    %cst_5 = arith.constant 0.000000e+00 : f32
    %6 = vector.broadcast %cst_5 : f32 to vector<32x32xf32>
    %7 = arith.maximumf %5, %6 : vector<32x32xf32>
    %c0_6 = arith.constant 0 : index
    %c0_7 = arith.constant 0 : index
    %c0_8 = arith.constant 0 : index
    %8 = vector.load %arg6[%c0_6, %c0_7, %c0_8] : memref<1x32x32xf32, #tpu.memory_space<vmem>>, vector<1x32x32xf32>
    %9 = vector.shape_cast %8 : vector<1x32x32xf32> to vector<32x32xf32>
    %cst_9 = arith.constant dense<0.000000e+00> : vector<32x32xf32>
    %10 = tpu.matmul %9, %7, %cst_9 {dimension_numbers = #tpu.dot_dimension_numbers<[1], [0], [0], [1], [0, 0, 1, 1], [], []>} : vector<32x32xf32>, vector<32x32xf32>, vector<32x32xf32> -> vector<32x32xf32>
    %c0_10 = arith.constant 0 : index
    %c0_11 = arith.constant 0 : index
    %c0_12 = arith.constant 0 : index
    %11 = vector.load %arg7[%c0_10, %c0_11, %c0_12] : memref<1x32x1xf32, #tpu.memory_space<vmem>>, vector<1x32x1xf32>
    %12 = vector.shape_cast %11 : vector<1x32x1xf32> to vector<32x1xf32>
    %13 = vector.broadcast %12 : vector<32x1xf32> to vector<32x32xf32>
    %14 = arith.addf %10, %13 : vector<32x32xf32>
    %cst_13 = arith.constant 0.000000e+00 : f32
    %15 = vector.broadcast %cst_13 : f32 to vector<32x32xf32>
    %16 = arith.maximumf %14, %15 : vector<32x32xf32>
    %c0_14 = arith.constant 0 : index
    %c0_15 = arith.constant 0 : index
    %17 = vector.load %arg8[%c0_14, %c0_15] : memref<1x32xf32, #tpu.memory_space<vmem>>, vector<1x32xf32>
    %cst_16 = arith.constant dense<0.000000e+00> : vector<1x32xf32>
    %18 = tpu.matmul %17, %16, %cst_16 {dimension_numbers = #tpu.dot_dimension_numbers<[1], [0], [0], [1], [0, 0, 1, 1], [], []>} : vector<1x32xf32>, vector<32x32xf32>, vector<1x32xf32> -> vector<1x32xf32>
    %c0_17 = arith.constant 0 : index
    %c0_18 = arith.constant 0 : index
    %19 = vector.load %arg9[%c0_17, %c0_18] : memref<1x1xf32, #tpu.memory_space<vmem>>, vector<1x1xf32>
    %20 = vector.broadcast %19 : vector<1x1xf32> to vector<1x32xf32>
    %21 = arith.addf %18, %20 : vector<1x32xf32>
    %cst_19 = arith.constant 0.000000e+00 : f32
    %cst_20 = arith.constant 2.000000e+00 : f32
    %22 = vector.broadcast %cst_19 : f32 to vector<1x32xf32>
    %23 = arith.maximumf %22, %21 : vector<1x32xf32>
    %24 = vector.broadcast %cst_20 : f32 to vector<1x32xf32>
    %25 = arith.minimumf %24, %23 : vector<1x32xf32>
    %c1_i32 = arith.constant 1 : i32
    %26 = tpu.dynamic_rotate %25 by %c1_i32 dim 1 : vector<1x32xf32>, i32 -> vector<1x32xf32>
    %27 = arith.subf %25, %26 : vector<1x32xf32>
    %c0_21 = arith.constant 0 : index
    %c0_22 = arith.constant 0 : index
    %28 = vector.load %arg3[%c0_21, %c0_22] : memref<1x32xf32, #tpu.memory_space<vmem>>, vector<1x32xf32>
    %29 = arith.mulf %27, %28 : vector<1x32xf32>
    %c0_23 = arith.constant 0 : index
    %c0_24 = arith.constant 0 : index
    %30 = vector.load %arg2[%c0_23, %c0_24] : memref<1x32xf32, #tpu.memory_space<vmem>>, vector<1x32xf32>
    %cst_25 = arith.constant 5.000000e-01 : f32
    %31 = vector.broadcast %cst_25 : f32 to vector<1x32xf32>
    %32 = arith.mulf %31, %29 : vector<1x32xf32>
    %33 = arith.subf %30, %32 : vector<1x32xf32>
    %c0_26 = arith.constant 0 : index
    %c0_27 = arith.constant 0 : index
    %34 = vector.load %arg10[%c0_26, %c0_27] : memref<1x32xf32, #tpu.memory_space<vmem>>, vector<1x32xf32>
    tpu.vector_store %arg10[%c0_26, %c0_27], %33 {strides = array<i32>} : memref<1x32xf32, #tpu.memory_space<vmem>>, vector<1x32xf32>,
    return
  }
  func.func @transform_0(%arg0: i32) -> (i32, i32) {
    %c0_i32 = arith.constant 0 : i32
    %c0_i32_0 = arith.constant 0 : i32
    %c0_i32_1 = arith.constant 0 : i32
    return %c0_i32, %c0_i32_0 : i32, i32
  }
  func.func @transform_1(%arg0: i32) -> (i32, i32) {
    %c0_i32 = arith.constant 0 : i32
    %c0_i32_0 = arith.constant 0 : i32
    %c0_i32_1 = arith.constant 0 : i32
    return %c0_i32, %c0_i32_0 : i32, i32
  }
  func.func @transform_2(%arg0: i32) -> (i32, i32) {
    %c0_i32 = arith.constant 0 : i32
    %c0_i32_0 = arith.constant 0 : i32
    %c0_i32_1 = arith.constant 0 : i32
    return %c0_i32, %c0_i32_0 : i32, i32
  }
  func.func @transform_3(%arg0: i32) -> (i32, i32) {
    %c0_i32 = arith.constant 0 : i32
    %c0_i32_0 = arith.constant 0 : i32
    %c0_i32_1 = arith.constant 0 : i32
    return %c0_i32, %c0_i32_0 : i32, i32
  }
  func.func @transform_4(%arg0: i32) -> (i32, i32) {
    %c0_i32 = arith.constant 0 : i32
    %c0_i32_0 = arith.constant 0 : i32
    %c0_i32_1 = arith.constant 0 : i32
    return %c0_i32, %c0_i32_0 : i32, i32
  }
  func.func @transform_5(%arg0: i32) -> (i32, i32, i32) {
    %c0_i32 = arith.constant 0 : i32
    %c0_i32_0 = arith.constant 0 : i32
    %c0_i32_1 = arith.constant 0 : i32
    %c0_i32_2 = arith.constant 0 : i32
    return %c0_i32, %c0_i32_0, %c0_i32_1 : i32, i32, i32
  }
  func.func @transform_6(%arg0: i32) -> (i32, i32, i32) {
    %c0_i32 = arith.constant 0 : i32
    %c0_i32_0 = arith.constant 0 : i32
    %c0_i32_1 = arith.constant 0 : i32
    %c0_i32_2 = arith.constant 0 : i32
    return %c0_i32, %c0_i32_0, %c0_i32_1 : i32, i32, i32
  }
  func.func @transform_7(%arg0: i32) -> (i32, i32) {
    %c0_i32 = arith.constant 0 : i32
    %c0_i32_0 = arith.constant 0 : i32
    %c0_i32_1 = arith.constant 0 : i32
    return %c0_i32, %c0_i32_0 : i32, i32
  }
  func.func @transform_8(%arg0: i32) -> (i32, i32) {
    %c0_i32 = arith.constant 0 : i32
    %c0_i32_0 = arith.constant 0 : i32
    %c0_i32_1 = arith.constant 0 : i32
    return %c0_i32, %c0_i32_0 : i32, i32
  }
  func.func @transform_9(%arg0: i32) -> (i32, i32) {
    %c0_i32 = arith.constant 0 : i32
    %c0_i32_0 = arith.constant 0 : i32
    %c0_i32_1 = arith.constant 0 : i32
    return %c0_i32, %c0_i32_0 : i32, i32
  }
}

</mosaic_0001>

<bundles_post_ra>
// kernel: tpu_custom_call.1
= control target key start
LH: loop header
LB: loop body
LE: loop exit
PB: predicated region body
PF: predicated region fallthrough
CT: control target
= control target key end

     0   :  { %s683_s0 = inlined_call_operand.vmem [shape: f32[10,32], index: 0, kind: input, shape index: {}]   ;;  %s684_s1 = inlined_call_operand.vmem [shape: f32[1,32], index: 1, kind: input, shape index: {}]   ;;  %s685_s2 = inlined_call_operand.vmem [shape: f32[1,32], index: 2, kind: input, shape index: {}]   ;;  %s686_s3 = inlined_call_operand.vmem [shape: f32[32,10], index: 3, kind: input, shape index: {}]   ;;  %s687_s4 = inlined_call_operand.vmem [shape: f32[32,1], index: 4, kind: input, shape index: {}]   ;;  %s688_s5 = inlined_call_operand.vmem [shape: f32[1,32,32], index: 5, kind: input, shape index: {}]   ;;  %s689_s6 = inlined_call_operand.vmem [shape: f32[1,32,1], index: 6, kind: input, shape index: {}]   ;;  %s690_s7 = inlined_call_operand.vmem [shape: f32[1,32], index: 7, kind: input, shape index: {}]   ;;  %s691_s8 = inlined_call_operand.<no memory space> [shape: f32[1,1], index: 8, kind: input, shape index: {}]   ;;  %s692_s9 = inlined_call_operand.hbm [shape: f32[1,32], index: 9, kind: output, shape index: {}]  }
   0x1   :  { %v14_v0 = vstv %s691_s8 }
   0x2   :  { %15 = vst [vmem:[#allocation2] sm:$0x1] %v14_v0 }
   0x3   :  { %v39_v1 = vld [vmem:[%s683_s0] sm:$0xff]  ;;  %v40_v2 = vld [vmem:[%s683_s0 + $0x8] sm:$0x3]  ;;  %vm78_vm0 = vcmask 1041408   ;;  %vm538_vm1 = vmmov 1   ;;  %vm65_vm3 = vcmask 80896  }
   0x4   :  { %v35_v3 = vld [vmem:[%s686_s3] sm:$0xff]  ;;  %v484_v4 = vpack.c.bf16 %v40_v2, %v39_v1  ;;  %vm485_vm2 = vmpackc.low %vm78_vm0, %vm538_vm1  ;;  %v539_v5 = vmov 0   ;;  %v43_v7 = vld [vmem:[%s687_s4 + $0x10] sm:$0xff] }
   0x5   :  { %453 = vmatprep.mubr.msk.f32.mxu0 %vm65_vm3, %v35_v3  ;;  %512 = vset.pattern.permute.xlu0 %v539_v5  ;;  %v41_v6 = vld [vmem:[%s687_s4] sm:$0xff]  ;;  %v36_v8 = vld [vmem:[%s686_s3 + $0x8] sm:$0xff]  ;;  %v37_v10 = vld [vmem:[%s686_s3 + $0x10] sm:$0xff] }
   0x6   :  { %486 = vmatprep.subr.msk.bf16.mxu0 %vm485_vm2, %v484_v4  ;;  %47 = vperm.xlu0 %512, %v41_v6   ;;  %v42_v9 = vld [vmem:[%s687_s4 + $0x8] sm:$0xff] }
   0x7   :  { %489 = vmatpush3.bf16.msk.msra.mxu0 %vm485_vm2, %v484_v4  ;;  %513 = vset.pattern.permute.xlu1 %v539_v5 }
   0x8   :  { %57 = vperm.xlu1 %513, %v43_v7  }
   0x9   :  { %16 = vsyncpa [#allocation4], 0  ;;  %v44_v11 = vld [vmem:[%s687_s4 + $0x18] sm:$0xff]  ;;  %v175_v13 = vld [vmem:[%s689_s6] sm:$0xff]  ;;  %vm199_vm4 = vcmask 261120   ;;  %v540_v40 = vmov 0.0|0.0   ;;  %v308_v61 = vlaneseq }
   0xa   :  { %454 = vmatmul.mubr.msk.f32.vlgmr.msra.gmra.mrb[0].mxu0 %vm65_vm3, %v36_v8  ;;  %52 = vperm.xlu0 %512, %v42_v9   ;;  %v38_v12 = vld [vmem:[%s686_s3 + $0x18] sm:$0xff]  ;;  %v176_v14 = vld [vmem:[%s689_s6 + $0x8] sm:$0xff]  ;;  %v177_v15 = vld [vmem:[%s689_s6 + $0x10] sm:$0xff]  ;;  %vm541_vm5 = vmmov 0   ;;  %v542_v41 = vmov 0.0   ;;  %s543_s20 = smov 32  }
   0xb   :  { %456 = vmatprep.mubr.msk.f32.mxu0 %vm65_vm3, %v37_v10  ;;  %v178_v16 = vld [vmem:[%s689_s6 + $0x18] sm:$0xff]  ;;  %v302_v17 = vld [vmem:[#allocation2] sm:$0x1]  ;;  %v172_v37 = vld [vmem:[%s688_s5 + $0x8] sm:$0xff]  ;;  %498 = vmatprep.subr.bf16.mxu0 %v540_v40  ;;  %v309_v62 = vshrl.u32 %v308_v61, 7  ;;  %vm387_vm6 = vcmask 1047808  }
   0xc   :  { %62 = vperm.xlu1 %513, %v44_v11   ;;  %v171_v18 = vld [vmem:[%s688_s5] sm:$0xff]  ;;  %v173_v38 = vld [vmem:[%s688_s5 + $0x10] sm:$0xff]  ;;  %v174_v39 = vld [vmem:[%s688_s5 + $0x18] sm:$0xff]  ;;  %s545_s25 = smov [#allocation3]   ;;  %vm404_vm7 = vcmask 253952  }
   0xd   :  { %467 = vmatprep.mubr.msk.f32.mxu1 %vm199_vm4, %v171_v18  ;;  %v301_v60 = vld [vmem:[%s690_s7] sm:$0x1]  ;;  %v310_v63 = vsub.s32 0, %v309_v62  ;;  %s544_s7 = smov 97   ;;  %s412_s26 = sshll.u32 %s545_s25, 4  ;;  %s413_s26 = int_to_ptr.vmem [resolvable:$true] %s412_s26 }
   0xe   :  { %457 = vmatmul.mubr.msk.f32.gmra.mrb[2].mxu0 %vm65_vm3, %v38_v12  ;;  %181 = vperm.xlu0 %512, %v175_v13   ;;  %v399_v11 = vld [vmem:[%s685_s2] sm:$0x1]  ;;  %s514_s27 = scalar_lea.vmem %s413_s26, 16  ;;  %s518_s28 = scalar_lea.vmem %s413_s26, 32 }
   0xf   :  { %481 = vmatprep.mubr.msk.f32.mxu0 %vm541_vm5, %v542_v41  ;;  %p515_p0 = scmp.ne.s32.totalorder %s413_s26, %s514_s27  ;;  %p519_p1 = scmp.lt.s32.totalorder %s413_s26, %s413_s26 }
  0x10   :  { %186 = vperm.xlu1 %513, %v176_v14   ;;  %p520_p2 = scmp.lt.s32.totalorder %s518_s28, %s514_s27 }
  0x12   :  { %191 = vperm.xlu0 %512, %v177_v15   ;;  %v401_v15 = vld [vmem:[%s684_s1] sm:$0x1]  ;;  %p521_p3 = por %p520_p2, %p519_p1 }
  0x14   :  { %196 = vperm.xlu1 %513, %v178_v16   ;;  %p522_p4 = pnand %p521_p3, %p515_p0 }
  0x16   :  { %305 = vperm.xlu0 %512, %v302_v17  }
  0x85   :  { %v48_v19 = vpop.permute.xlu0 %47 }
  0x87   :  { %v58_v20 = vpop.permute.xlu1 %57 }
  0x89   :  { %v53_v21 = vpop.permute.xlu0 %52 }
  0x8b   :  { %v63_v27 = vpop.permute.xlu1 %62 }
  0x8d   :  { %v182_v43 = vpop.permute.xlu0 %181 }
  0x8f   :  { %v187_v42 = vpop.permute.xlu1 %186 }
  0x91   :  { %v192_v52 = vpop.permute.xlu0 %191 }
  0x93   :  { %v197_v49 = vpop.permute.xlu1 %196 }
  0x95   :  { %v306_v0 = vpop.permute.xlu0 %305 }
  0x96   :  { %v311_v1 = vrot.slane %v306_v0, %v310_v63 }
  0xdd   :  { %v455_v22 = vpop.f32.mrb[0].mxu0 }
  0xde   :  { %v154_v23 = vadd.f32 %v455_v22, %v53_v21  ;;  %v148_v24 = vpop.f32.mrb[1].mxu0 }
  0xdf   :  { %v149_v25 = vadd.f32 %v148_v24, %v48_v19 }
  0xe0   :  { %v168_v26 = vmax.f32 %v154_v23, 0.0 }
  0xe1   :  { %v167_v28 = vmax.f32 %v149_v25, 0.0  ;;  %v458_v29 = vpop.f32.mrb[2].mxu0 }
  0xe2   :  { %v164_v30 = vadd.f32 %v458_v29, %v63_v27  ;;  %v158_v31 = vpop.f32.mrb[3].mxu0 }
  0xe3   :  { %v159_v32 = vadd.f32 %v158_v31, %v58_v20  ;;  %v490_v33 = vpack.c.bf16 %v168_v26, %v167_v28 }
  0xe4   :  { %v170_v34 = vmax.f32 %v164_v30, 0.0 }
  0xe5   :  { %v169_v35 = vmax.f32 %v159_v32, 0.0  ;;  %491 = vmatprep.subr.bf16.mxu1 %v490_v33 }
  0xe6   :  { %493 = vmatpush3.bf16.msra.mxu1 %v490_v33 }
  0xe7   :  { %v494_v36 = vpack.c.bf16 %v170_v34, %v169_v35 }
  0xe9   :  { %495 = vmatprep.subr.bf16.mxu1 %v494_v36 }
  0xea   :  { %497 = vmatpush3.bf16.msra.mxu1 %v494_v36 }
  0xed   :  { %468 = vmatmul.mubr.msk.f32.vlgmr.msra.gmra.mrb[0].mxu1 %vm199_vm4, %v172_v37 }
  0xee   :  { %470 = vmatprep.mubr.msk.f32.mxu1 %vm199_vm4, %v173_v38 }
  0xf1   :  { %471 = vmatmul.mubr.msk.f32.gmra.mrb[2].mxu1 %vm199_vm4, %v174_v39 }
 0x1c0   :  { %v469_v44 = vpop.f32.mrb[0].mxu1 }
 0x1c1   :  { %v284_v45 = vadd.f32 %v469_v44, %v187_v42  ;;  %v278_v46 = vpop.f32.mrb[1].mxu1 }
 0x1c2   :  { %v279_v47 = vadd.f32 %v278_v46, %v182_v43 }
 0x1c3   :  { %v298_v48 = vmax.f32 %v284_v45, 0.0 }
 0x1c4   :  { %v297_v50 = vmax.f32 %v279_v47, 0.0  ;;  %v472_v51 = vpop.f32.mrb[2].mxu1 }
 0x1c5   :  { %v294_v53 = vadd.f32 %v472_v51, %v197_v49  ;;  %v288_v54 = vpop.f32.mrb[3].mxu1 }
 0x1c6   :  { %v499_v55 = vpack.c.bf16 %v298_v48, %v297_v50  ;;  %v289_v56 = vadd.f32 %v288_v54, %v192_v52 }
 0x1c7   :  { %v300_v57 = vmax.f32 %v294_v53, 0.0 }
 0x1c8   :  { %v299_v58 = vmax.f32 %v289_v56, 0.0  ;;  %500 = vmatpush3.bf16.msra.mxu0 %v499_v55 }
 0x1c9   :  { %501 = vmatprep.subr.bf16.mxu0 %v540_v40 }
 0x1ca   :  { %v502_v59 = vpack.c.bf16 %v300_v57, %v299_v58 }
 0x1cc   :  { %503 = vmatpush3.bf16.msra.mxu0 %v502_v59 }
 0x1cf   :  { %482 = vmatmul.mubr.msk.f32.vlgmr.msra.gmra.mrb[4].mxu0 %vm199_vm4, %v301_v60 }
 0x2a2   :  { %v381_v2 = vpop.f32.mrb[4].mxu0 }
 0x2a3   :  { %v382_v3 = vadd.f32 %v381_v2, %v311_v1  ;;  %v483_v4 = vpop.f32.mrb[5].mxu0 }
 0x2a5   :  { %v385_v5 = vmax.f32 %v382_v3, 0.0 }
 0x2a7   :  { %v386_v6 = vmin.f32 %v385_v5, 2.0 }
 0x2a9   :  { %388 = vrot.lane.b32.xlu1 %v386_v6, %s543_s20 }
 0x31b   :  { %v389_v7 = vpop.permute.xlu1 %388 }
 0x31c   :  { %v390_v8 = vsel %vm387_vm6, %v389_v7, %v386_v6 }
 0x31d   :  { %391 = vrot.lane.b32.xlu0 %v390_v8, %s543_s20 }
 0x38f   :  { %v392_v9 = vpop.permute.xlu0 %391 }
 0x390   :  { %v393_v10 = vsel %vm387_vm6, %v392_v9, %v386_v6 }
 0x391   :  { %395 = vrot.lane.b32.xlu1 %v393_v10, %s544_s7 }
 0x403   :  { %v396_v12 = vpop.permute.xlu1 %395 }
 0x404   :  { %v398_v13 = vsub.f32 %v386_v6, %v396_v12 }
 0x406   :  { %v400_v14 = vmul.f32 %v399_v11, %v398_v13 }
 0x408   :  { %v402_v16 = vmul.f32 0.5, %v400_v14 }
 0x40a   :  { %v403_v17 = vsub.f32 %v401_v15, %v402_v16 }
 0x40c   :  { %405 = vst.msk [vmem:[#allocation3] sm:$0x1] %vm404_vm7, %v403_v17 }
 0x40d   :  { %525 = shalt.err (!%p522_p4)
}
 0x40e   :  { %s526_s30 = scalar_lea.hbm %s692_s9, 16 }
 0x40f   :  { %p527_p5 = scmp.ne.s32.totalorder %s692_s9, %s526_s30  ;;  %p530_p6 = scmp.lt.u32.totalorder %s526_s30, %s692_s9 }
 0x411   :  { %p532_p7 = pnand %p530_p6, %p527_p5 }
 0x413   :  { %535 = shalt.err (!%p532_p7)
}
 0x414   :  { %415 = dma.vmem_to_hbm [thread:$0]  %s413_s26, 16, %s692_s9, [#allocation4]  }
 0x415   :  { %536 = dma.done.wait [#allocation4], 16  }
 0x416   :  { %537 = vsyncadd [#allocation4], 4294967280 }
 0x417   :  { %419 = vsyncpa [#allocation4], 1 }

</bundles_post_ra>
